<compile_context>
chip_gen: v6e
topology: v6e:2x2x1
jax: 0.10.0
libtpu: 0.0.40
codegen_flags: <defaults>
</compile_context>

<pallas_src>
import functools

import jax
import jax.numpy as jnp
from jax.experimental import pallas as pl
from jax.experimental.pallas import tpu as pltpu


def _round_up(x, m):
    return ((x + m - 1) // m) * m


def rank_loss_kernel(s1_ref, s2_ref, onehot_ref, out_ref, *, margin):
    """One (tb, C) row block: row-softmax both inputs, fused gather, clamp."""

    def softmax_rows(s):
        s = s.astype(jnp.float32)              # in-kernel upcast of native-dtype input
        m = jnp.max(s, axis=1, keepdims=True)  # XLU cross-lane reduce
        e = jnp.exp(s - m)                     # EUP
        denom = jnp.sum(e, axis=1, keepdims=True)
        # approx=True lowers to the EUP vrcp (otherwise-idle issue slot).
        return e * pl.reciprocal(denom, approx=True)

    # Finish scores1 before touching scores2 so only one extra full-width
    # (tb, C) f32 intermediate is live at a time.
    d = softmax_rows(s1_ref[...])
    d = d - softmax_rows(s2_ref[...])

    # Single fused gather matmul, full f32 precision: (p1 - p2) @ onehot.
    # The kernel is HBM-bound, so the extra MXU passes are free.
    gathered = jnp.dot(d, onehot_ref[...], preferred_element_type=jnp.float32)

    out_ref[...] = jnp.maximum(gathered + margin, 0.0).astype(out_ref.dtype)


def _onehot_blockspec(C, Tp):
    # The one-hot block index never changes across the grid -> single-buffer
    # it (saves a C*Tp*4 VMEM buffer; matters at vocab-scale C).
    idx = lambda i: (0, 0)
    try:
        return pl.BlockSpec((C, Tp), idx, pipeline_mode=pl.Buffered(1))
    except TypeError:  # older BlockSpec signature without pipeline_mode
        return pl.BlockSpec((C, Tp), idx)


def rank_loss(scores1, scores2, target, margin):
    assert scores1.ndim == 2 and scores1.shape == scores2.shape
    B, C = scores1.shape
    T = target.shape[0]

    # Keep the caller's native dtype (no wrapper-side f32 upcast).
    in_dtype = jnp.result_type(scores1.dtype, scores2.dtype)
    scores1 = scores1.astype(in_dtype)
    scores2 = scores2.astype(in_dtype)
    out_dtype = in_dtype  # bf16 callers get a bf16 output (half the write bytes)

    in_isz = jnp.dtype(in_dtype).itemsize
    out_isz = jnp.dtype(out_dtype).itemsize
    sublane = 8 * max(1, 4 // in_isz)  # 8 for f32, 16 for bf16 sublane packing

    # --- lane-dense target dimension: pad to a multiple of 128 --------------
    Tp = _round_up(T, 128)
    # Padded slots get class index -1 so they match no class (exact zeros in
    # the gather, never aliasing class 0); they are sliced off below anyway.
    tgt = jnp.full((Tp,), -1, jnp.int32).at[:T].set(target.astype(jnp.int32))
    onehot = (jnp.arange(C, dtype=jnp.int32)[:, None] == tgt[None, :]).astype(
        jnp.float32
    )
    # TODO(synk): for vocab-scale C, build the one-hot in-kernel from a
    # scalar-prefetched target (PrefetchScalarGridSpec) and add a trailing
    # "arbitrary" grid axis over C with an online-softmax accumulator.

    # --- generation-specific VMEM budget -------------------------------------
    try:
        phys_vmem = int(pltpu.get_tpu_info().vmem_capacity_bytes)
    except Exception:
        phys_vmem = 64 << 20  # conservative fallback (v7x per-TC)
    # ~48 MiB usable on v7x (64 MiB physical), ~100 MiB on v5e/v6e (128 MiB).
    vmem_limit = int(min(phys_vmem - (16 << 20), 100 << 20))
    vmem_limit = max(vmem_limit, 32 << 20)
    budget = vmem_limit - (8 << 20)  # headroom for compiler temporaries

    # Per-row VMEM bytes: two double-buffered score inputs, double-buffered
    # output, plus ~4 f32 (tb, C) in-kernel intermediates (exp / softmax / d).
    per_row = (2 * 2 * C * in_isz) + (2 * Tp * out_isz) + (4 * C * 4)
    fixed = 2 * C * Tp * 4  # one-hot (counted at 2x to stay safe either way)

    tb = max(sublane, (budget - fixed) // per_row)
    tb = (tb // sublane) * sublane
    # Megacore (v7x): keep >= 2 grid steps when B allows so ("parallel",)
    # shards across both TensorCores.  No batch padding: the last block may be
    # ragged; Pallas masks its out-of-range writes.
    tb = min(tb, max(sublane, _round_up((B + 1) // 2, sublane)))
    tb = min(tb, _round_up(B, sublane))
    num_steps = -(-B // tb)

    # margin is a trace-time constant (one compile per distinct margin value;
    # fine for a fixed module hyperparameter).
    kernel = functools.partial(rank_loss_kernel, margin=float(margin))

    out = pl.pallas_call(
        kernel,
        out_shape=jax.ShapeDtypeStruct((B, Tp), out_dtype),
        grid=(num_steps,),
        in_specs=[
            pl.BlockSpec((tb, C), lambda i: (i, 0)),
            pl.BlockSpec((tb, C), lambda i: (i, 0)),
            _onehot_blockspec(C, Tp),
        ],
        out_specs=pl.BlockSpec((tb, Tp), lambda i: (i, 0)),
        compiler_params=pltpu.CompilerParams(
            dimension_semantics=("parallel",),
            vmem_limit_bytes=vmem_limit,
        ),
    )(scores1, scores2, onehot)

    return out[:, :T]


def rank_loss_ref(scores1, scores2, target, margin):
    p1 = jax.nn.softmax(scores1.astype(jnp.float32), axis=1)[:, target]
    p2 = jax.nn.softmax(scores2.astype(jnp.float32), axis=1)[:, target]
    return jnp.maximum(p1 - p2 + margin, 0.0)


if __name__ == "__main__":
    # Small, deterministic example: batch=8, classes=128, 8 target indices.
    B, C, T = 8, 128, 8
    margin = 0.2

    key = jax.random.PRNGKey(0)
    k1, k2, k3 = jax.random.split(key, 3)
    scores1 = jax.random.normal(k1, (B, C), dtype=jnp.float32)
    scores2 = jax.random.normal(k2, (B, C), dtype=jnp.float32)
    target = jax.random.randint(k3, (T,), 0, C, dtype=jnp.int32)

    out = rank_loss(scores1, scores2, target, margin)
    out = jax.block_until_ready(out)

    ref = rank_loss_ref(scores1, scores2, target, margin)
    assert out.shape == (B, T)
    # f32 gather matmul restores near-exact results; the only remaining
    # approximation is the EUP approx reciprocal in the softmax denominator.
    assert jnp.allclose(out.astype(jnp.float32), ref, atol=2e-3, rtol=0.0), (
        f"max abs err = {jnp.max(jnp.abs(out.astype(jnp.float32) - ref))}"
    )

    print("KERNEL_OK")
</pallas_src>

<mosaic_0001>
module attributes {stable_mosaic.version = 11 : i64} {
  func.func @rank_loss_kernel(%arg0: i32, %arg1: memref<8x128xf32, #tpu.memory_space<vmem>>, %arg2: memref<8x128xf32, #tpu.memory_space<vmem>>, %arg3: memref<128x128xf32, #tpu.memory_space<vmem>>, %arg4: memref<8x128xf32, #tpu.memory_space<vmem>>) attributes {dimension_semantics = [#tpu.dimension_semantics<parallel>], iteration_bounds = array<i64: 1>, scalar_prefetch = 0 : i64, scratch_operands = 0 : i64, tpu.core_type = #tpu.core_type<tc>, window_params = [{transform_indices = @transform_0, window_bounds = array<i64: 8, 128>}, {transform_indices = @transform_1, window_bounds = array<i64: 8, 128>}, {pipeline_mode = #tpu.pipeline_mode<synchronous>, transform_indices = @transform_2, window_bounds = array<i64: 128, 128>}, {transform_indices = @transform_3, window_bounds = array<i64: 8, 128>}]} {
    %c0 = arith.constant 0 : index
    %c0_0 = arith.constant 0 : index
    %0 = vector.load %arg1[%c0, %c0_0] : memref<8x128xf32, #tpu.memory_space<vmem>>, vector<8x128xf32>
    %cst = arith.constant dense<0xFF800000> : vector<8xf32>
    %1 = vector.multi_reduction <maximumf>, %0, %cst [1] : vector<8x128xf32> to vector<8xf32>
    %2 = vector.shape_cast %1 : vector<8xf32> to vector<8x1xf32>
    %3 = vector.broadcast %2 : vector<8x1xf32> to vector<8x128xf32>
    %4 = arith.subf %0, %3 : vector<8x128xf32>
    %5 = math.exp %4 : vector<8x128xf32>
    %cst_1 = arith.constant dense<0.000000e+00> : vector<8xf32>
    %6 = vector.multi_reduction <add>, %5, %cst_1 [1] : vector<8x128xf32> to vector<8xf32>
    %7 = vector.shape_cast %6 : vector<8xf32> to vector<8x1xf32>
    %8 = tpu.reciprocal %7 {approx = true} : vector<8x1xf32> -> vector<8x1xf32>
    %9 = vector.broadcast %8 : vector<8x1xf32> to vector<8x128xf32>
    %10 = arith.mulf %5, %9 : vector<8x128xf32>
    %c0_2 = arith.constant 0 : index
    %c0_3 = arith.constant 0 : index
    %11 = vector.load %arg2[%c0_2, %c0_3] : memref<8x128xf32, #tpu.memory_space<vmem>>, vector<8x128xf32>
    %cst_4 = arith.constant dense<0xFF800000> : vector<8xf32>
    %12 = vector.multi_reduction <maximumf>, %11, %cst_4 [1] : vector<8x128xf32> to vector<8xf32>
    %13 = vector.shape_cast %12 : vector<8xf32> to vector<8x1xf32>
    %14 = vector.broadcast %13 : vector<8x1xf32> to vector<8x128xf32>
    %15 = arith.subf %11, %14 : vector<8x128xf32>
    %16 = math.exp %15 : vector<8x128xf32>
    %cst_5 = arith.constant dense<0.000000e+00> : vector<8xf32>
    %17 = vector.multi_reduction <add>, %16, %cst_5 [1] : vector<8x128xf32> to vector<8xf32>
    %18 = vector.shape_cast %17 : vector<8xf32> to vector<8x1xf32>
    %19 = tpu.reciprocal %18 {approx = true} : vector<8x1xf32> -> vector<8x1xf32>
    %20 = vector.broadcast %19 : vector<8x1xf32> to vector<8x128xf32>
    %21 = arith.mulf %16, %20 : vector<8x128xf32>
    %22 = arith.subf %10, %21 : vector<8x128xf32>
    %c0_6 = arith.constant 0 : index
    %c0_7 = arith.constant 0 : index
    %23 = vector.load %arg3[%c0_6, %c0_7] : memref<128x128xf32, #tpu.memory_space<vmem>>, vector<128x128xf32>
    %cst_8 = arith.constant dense<0.000000e+00> : vector<8x128xf32>
    %24 = tpu.matmul %22, %23, %cst_8 {dimension_numbers = #tpu.dot_dimension_numbers<[1], [0], [0], [1], [0, 0, 1, 1], [], []>} : vector<8x128xf32>, vector<128x128xf32>, vector<8x128xf32> -> vector<8x128xf32>
    %cst_9 = arith.constant 2.000000e-01 : f32
    %25 = vector.broadcast %cst_9 : f32 to vector<8x128xf32>
    %26 = arith.addf %24, %25 : vector<8x128xf32>
    %cst_10 = arith.constant 0.000000e+00 : f32
    %27 = vector.broadcast %cst_10 : f32 to vector<8x128xf32>
    %28 = arith.maximumf %26, %27 : vector<8x128xf32>
    %c0_11 = arith.constant 0 : index
    %c0_12 = arith.constant 0 : index
    %29 = vector.load %arg4[%c0_11, %c0_12] : memref<8x128xf32, #tpu.memory_space<vmem>>, vector<8x128xf32>
    tpu.vector_store %arg4[%c0_11, %c0_12], %28 {strides = array<i32>} : memref<8x128xf32, #tpu.memory_space<vmem>>, vector<8x128xf32>,
    return
  }
  func.func @transform_0(%arg0: i32) -> (i32, i32) {
    %c0_i32 = arith.constant 0 : i32
    %c0_i32_0 = arith.constant 0 : i32
    return %arg0, %c0_i32 : i32, i32
  }
  func.func @transform_1(%arg0: i32) -> (i32, i32) {
    %c0_i32 = arith.constant 0 : i32
    %c0_i32_0 = arith.constant 0 : i32
    return %arg0, %c0_i32 : i32, i32
  }
  func.func @transform_2(%arg0: i32) -> (i32, i32) {
    %c0_i32 = arith.constant 0 : i32
    %c0_i32_0 = arith.constant 0 : i32
    %c0_i32_1 = arith.constant 0 : i32
    return %c0_i32, %c0_i32_0 : i32, i32
  }
  func.func @transform_3(%arg0: i32) -> (i32, i32) {
    %c0_i32 = arith.constant 0 : i32
    %c0_i32_0 = arith.constant 0 : i32
    return %arg0, %c0_i32 : i32, i32
  }
}

</mosaic_0001>

<bundles_post_ra>
// kernel: tpu_custom_call.1
= control target key start
LH: loop header
LB: loop body
LE: loop exit
PB: predicated region body
PF: predicated region fallthrough
CT: control target
= control target key end

     0   :  { %8 = vsyncpa [#allocation3], 0  ;;  %s371_s0 = inlined_call_operand.hbm [shape: f32[8,128], index: 0, kind: input, shape index: {}]   ;;  %s372_s1 = inlined_call_operand.hbm [shape: f32[8,128], index: 1, kind: input, shape index: {}]   ;;  %s373_s2 = inlined_call_operand.hbm [shape: f32[128,128], index: 2, kind: input, shape index: {}]   ;;  %s374_s3 = inlined_call_operand.hbm [shape: f32[8,128], index: 3, kind: output, shape index: {}]  }
   0x1   :  { %9 = vsyncpa [#allocation6], 0 }
   0x2   :  { %10 = vsyncpa [#allocation4], 0  ;;  %s331_s12 = smov [#allocation5]   ;;  %s332_s14 = smov [#allocation2]  }
   0x3   :  { %s27_s13 = sshll.u32 %s331_s12, 4  ;;  %s17_s15 = sshll.u32 %s332_s14, 4  ;;  %s28_s13 = int_to_ptr.vmem [resolvable:$true] %s27_s13  ;;  %s18_s15 = int_to_ptr.vmem [resolvable:$true] %s17_s15 }
   0x4   :  { %s253_s16 = scalar_lea.vmem %s28_s13, 128  ;;  %p258_p1 = scmp.lt.s32.totalorder %s28_s13, %s28_s13 }
   0x5   :  { %p254_p0 = scmp.ne.s32.totalorder %s28_s13, %s253_s16  ;;  %p259_p2 = scmp.lt.s32.totalorder %s253_s16, %s253_s16 }
   0x7   :  { %p260_p3 = por %p259_p2, %p258_p1 }
   0x9   :  { %p261_p4 = pnand %p260_p3, %p254_p0 }
   0xb   :  { %264 = shalt.err (!%p261_p4)
}
   0xc   :  { %30 = dma.hbm_to_vmem [thread:$0]  %s372_s1, 128, %s28_s13, [#allocation6]  }
   0xd   :  { %s273_s19 = scalar_lea.vmem %s18_s15, 128  ;;  %p278_p6 = scmp.lt.s32.totalorder %s18_s15, %s18_s15 }
   0xe   :  { %p274_p5 = scmp.ne.s32.totalorder %s18_s15, %s273_s19  ;;  %p279_p7 = scmp.lt.s32.totalorder %s273_s19, %s273_s19 }
  0x10   :  { %p280_p8 = por %p279_p7, %p278_p6 }
  0x12   :  { %p281_p9 = pnand %p280_p8, %p274_p5 }
  0x14   :  { %284 = shalt.err (!%p281_p9)
}
  0x15   :  { %20 = dma.hbm_to_vmem [thread:$0]  %s371_s0, 128, %s18_s15, [#allocation3]  }
  0x16   :  { %s333_s22 = smov [#allocation7]  }
  0x17   :  { %s36_s23 = sshll.u32 %s333_s22, 4  ;;  %s37_s23 = int_to_ptr.vmem [resolvable:$true] %s36_s23 }
  0x18   :  { %s293_s24 = scalar_lea.vmem %s37_s23, 2048  ;;  %p298_p11 = scmp.lt.s32.totalorder %s37_s23, %s37_s23 }
  0x19   :  { %p294_p10 = scmp.ne.s32.totalorder %s37_s23, %s293_s24  ;;  %p299_p12 = scmp.lt.s32.totalorder %s293_s24, %s293_s24 }
  0x1b   :  { %p300_p13 = por %p299_p12, %p298_p11 }
  0x1d   :  { %p301_p0 = pnand %p300_p13, %p294_p10 }
  0x1f   :  { %304 = shalt.err (!%p301_p0)
}
  0x20   :  { %s334_s1 = smov 128   ;;  %s335_s25 = smov 8  }
  0x21   :  { %42 = dma.hbm_to_vmem [thread:$0]  %s373_s2, 2048, %s37_s23, [#allocation6], %s334_s1, %s334_s1, %s335_s25  }
  0x22   :  { %325 = dma.done.wait [#allocation3], 128  }
  0x23   :  { %326 = vsyncadd [#allocation3], 4294967168 }
  0x24   :  { %327 = dma.done.wait [#allocation6], 2176  }
  0x25   :  { %328 = vsyncadd [#allocation6], 4294965120  ;;  %v52_v0 = vld [vmem:[#allocation2] sm:$0xff]  ;;  %v62_v1 = vld [vmem:[#allocation5] sm:$0xff]  ;;  %v336_v3 = vmov 0.0   ;;  %vm337_vm0 = vmmov 0  }
  0x26   :  { %53 = vmax.xlane.f32.xlu0 %v52_v0  ;;  %v88_v2 = vld [vmem:[#allocation7 + $0x78] sm:$0xff]  ;;  %194 = vmatprep.subr.mxu0 %v336_v3  ;;  %v87_v4 = vld [vmem:[#allocation7 + $0x70] sm:$0xff]  ;;  %v86_v5 = vld [vmem:[#allocation7 + $0x68] sm:$0xff]  ;;  %s338_s0 = smov [#allocation8]  }
  0x27   :  { %195 = vmatpush3.msra.mxu0 %v88_v2  ;;  %v85_v6 = vld [vmem:[#allocation7 + $0x60] sm:$0xff]  ;;  %v84_v7 = vld [vmem:[#allocation7 + $0x58] sm:$0xff]  ;;  %v83_v16 = vld [vmem:[#allocation7 + $0x50] sm:$0xff]  ;;  %226 = vmatprep.mubr.msk.f32.mxu0 %vm337_vm0, %v336_v3  ;;  %s167_s2 = sshll.u32 %s338_s0, 4  ;;  %s168_s2 = int_to_ptr.vmem [resolvable:$true] %s167_s2 }
  0x28   :  { %196 = vmatprep.subr.mxu0 %v336_v3  ;;  %v82_v17 = vld [vmem:[#allocation7 + $0x48] sm:$0xff]  ;;  %v81_v18 = vld [vmem:[#allocation7 + $0x40] sm:$0xff]  ;;  %v80_v19 = vld [vmem:[#allocation7 + $0x38] sm:$0xff]  ;;  %s305_s28 = scalar_lea.vmem %s168_s2, 128  ;;  %p310_p2 = scmp.lt.s32.totalorder %s168_s2, %s168_s2 }
  0x29   :  { %197 = vmatpush3.msra.mxu0 %v87_v4  ;;  %v79_v20 = vld [vmem:[#allocation7 + $0x30] sm:$0xff]  ;;  %v78_v21 = vld [vmem:[#allocation7 + $0x28] sm:$0xff]  ;;  %v77_v22 = vld [vmem:[#allocation7 + $0x20] sm:$0xff]  ;;  %p306_p1 = scmp.ne.s32.totalorder %s168_s2, %s305_s28  ;;  %p311_p3 = scmp.lt.s32.totalorder %s305_s28, %s305_s28 }
  0x2a   :  { %63 = vmax.xlane.f32.xlu0 %v62_v1  ;;  %198 = vmatprep.subr.mxu0 %v336_v3  ;;  %v76_v23 = vld [vmem:[#allocation7 + $0x18] sm:$0xff]  ;;  %v75_v24 = vld [vmem:[#allocation7 + $0x10] sm:$0xff]  ;;  %v74_v25 = vld [vmem:[#allocation7 + $0x8] sm:$0xff] }
  0x2b   :  { %199 = vmatpush3.msra.mxu0 %v86_v5  ;;  %v73_v26 = vld [vmem:[#allocation7] sm:$0xff]  ;;  %p312_p4 = por %p311_p3, %p310_p2 }
  0x2c   :  { %200 = vmatprep.subr.mxu0 %v336_v3 }
  0x2d   :  { %201 = vmatpush3.msra.mxu0 %v85_v6  ;;  %p313_p5 = pnand %p312_p4, %p306_p1 }
  0x2e   :  { %202 = vmatprep.subr.mxu0 %v336_v3 }
  0x2f   :  { %203 = vmatpush3.msra.mxu0 %v84_v7 }
  0x30   :  { %204 = vmatprep.subr.mxu0 %v336_v3 }
  0x31   :  { %205 = vmatpush3.msra.mxu0 %v83_v16 }
  0x32   :  { %206 = vmatprep.subr.mxu0 %v336_v3 }
  0x33   :  { %207 = vmatpush3.msra.mxu0 %v82_v17 }
  0x34   :  { %208 = vmatprep.subr.mxu0 %v336_v3 }
  0x35   :  { %209 = vmatpush3.msra.mxu0 %v81_v18 }
  0x36   :  { %210 = vmatprep.subr.mxu0 %v336_v3 }
  0x37   :  { %211 = vmatpush3.msra.mxu0 %v80_v19 }
  0x38   :  { %212 = vmatprep.subr.mxu0 %v336_v3 }
  0x39   :  { %213 = vmatpush3.msra.mxu0 %v79_v20 }
  0x3a   :  { %214 = vmatprep.subr.mxu0 %v336_v3 }
  0x3b   :  { %215 = vmatpush3.msra.mxu0 %v78_v21 }
  0x3c   :  { %216 = vmatprep.subr.mxu0 %v336_v3 }
  0x3d   :  { %217 = vmatpush3.msra.mxu0 %v77_v22 }
  0x3e   :  { %218 = vmatprep.subr.mxu0 %v336_v3 }
  0x3f   :  { %219 = vmatpush3.msra.mxu0 %v76_v23 }
  0x40   :  { %220 = vmatprep.subr.mxu0 %v336_v3 }
  0x41   :  { %221 = vmatpush3.msra.mxu0 %v75_v24 }
  0x42   :  { %222 = vmatprep.subr.mxu0 %v336_v3 }
  0x43   :  { %223 = vmatpush3.msra.mxu0 %v74_v25 }
  0x44   :  { %224 = vmatprep.subr.mxu0 %v336_v3 }
  0x45   :  { %225 = vmatpush3.msra.mxu0 %v73_v26 }
  0xaf   :  { %v54_v8 = vpop.xlane.xlu0 %53 }
  0xb0   :  { %v55_v9 = vsub.f32 %v52_v0, %v54_v8 }
  0xb2   :  { %v56_v10 = vmul.f32 1.442695, %v55_v9 }
  0xb3   :  { %v64_v11 = vpop.xlane.xlu0 %63 }
  0xb4   :  { %237 = vpow2.f32 %v56_v10  ;;  %v65_v12 = vsub.f32 %v62_v1, %v64_v11 }
  0xb6   :  { %v66_v13 = vmul.f32 1.442695, %v65_v12 }
  0xb8   :  { %239 = vpow2.f32 %v66_v13 }
  0xc1   :  { %v238_v14 = vpop.eup %237 }
  0xc2   :  { %58 = vadd.xlane.f32.xlu1 %v238_v14 }
  0xc5   :  { %v240_v15 = vpop.eup %239 }
  0xc6   :  { %68 = vadd.xlane.f32.xlu1 %v240_v15 }
 0x14b   :  { %v59_v27 = vpop.xlane.xlu1 %58 }
 0x14c   :  { %241 = vrcp.f32 %v59_v27 }
 0x14f   :  { %v69_v28 = vpop.xlane.xlu1 %68 }
 0x150   :  { %243 = vrcp.f32 %v69_v28 }
 0x159   :  { %v242_v29 = vpop.eup %241 }
 0x15a   :  { %v61_v31 = vmul.f32 %v242_v29, %v238_v14 }
 0x15d   :  { %v244_v30 = vpop.eup %243 }
 0x15e   :  { %v71_v32 = vmul.f32 %v244_v30, %v240_v15 }
 0x160   :  { %v72_v33 = vsub.f32 %v61_v31, %v71_v32 }
 0x162   :  { %227 = vmatmul.mubr.f32.vlgmr.msra.gmra.mxu0 %v72_v33 }
 0x222   :  { %v155_v34 = vpop.f32.mrf.mxu0 }
 0x223   :  { %v156_v35 = vadd.f32 0.2, %v155_v34 }
 0x224   :  { %v228_v36 = vpop.f32.mrf.mxu0 }
 0x225   :  { %v159_v37 = vmax.f32 %v156_v35, 0.0 }
 0x227   :  { %160 = vst [vmem:[#allocation8] sm:$0xff] %v159_v37 }
 0x228   :  { %316 = shalt.err (!%p313_p5)
}
 0x229   :  { %170 = dma.vmem_to_hbm [thread:$0]  %s168_s2, 128, %s374_s3, [#allocation4]  }
 0x22a   :  { %329 = dma.done.wait [#allocation4], 128  }
 0x22b   :  { %330 = vsyncadd [#allocation4], 4294967168 }
 0x22c   :  { %174 = vsyncpa [#allocation3], 1 }
 0x22d   :  { %175 = vsyncpa [#allocation6], 1 }
 0x22e   :  { %176 = vsyncpa [#allocation4], 1 }

</bundles_post_ra>
